<compile_context>
chip_gen: v5e
topology: v5e:2x2
jax: 0.10.0
libtpu: 0.0.40
codegen_flags: <defaults>
</compile_context>

<pallas_src>
import math
from functools import partial

import jax
import jax.numpy as jnp
from jax.experimental import pallas as pl
from jax.experimental.pallas import tpu as pltpu

_MIB = 1024 * 1024


# ---------------------------------------------------------------------------
# helpers (plain JAX / Python, run in the wrapper)
# ---------------------------------------------------------------------------
def _vmem_capacity_bytes():
    try:
        return int(pltpu.get_tpu_info().vmem_capacity_bytes)
    except Exception:
        return 64 * _MIB  # be conservative (v7x-sized) if the query is unavailable


def _pick_hw_tile(hw, c, itemsize, target_block_bytes):
    """Lane (last-dim) tile: a multiple of 128 sized to ~target bytes per block.
    If HW itself is small, use the full HW (full-dim blocks are exempt from the
    128 rule); otherwise the ragged last tile is masked in-kernel."""
    lanes = (target_block_bytes // max(1, c * itemsize)) // 128 * 128
    lanes = max(128, int(lanes))
    return hw if hw <= lanes else lanes


def _conv1d_sigmoid(pooled, weight):
    """pooled: (B, C) f32 channel means; weight: (k,) Conv1d taps.
    Cross-correlation with zero padding (k-1)//2, no bias, then sigmoid."""
    B, C = pooled.shape
    k = weight.shape[0]
    pad = (k - 1) // 2
    yp = jnp.pad(pooled, ((0, 0), (pad, pad)))
    conv = jnp.zeros((B, C), jnp.float32)
    for j in range(k):
        conv = conv + weight[j] * yp[:, j:j + C]
    return jax.nn.sigmoid(conv)


# ---------------------------------------------------------------------------
# FUSED path: pool -> k-tap channel conv -> sigmoid -> scale, one HBM pass
# ---------------------------------------------------------------------------
def _eca_fused_kernel(w_ref, x_ref, o_ref, *, k, c, inv_hw):
    # w_ref : SMEM (k,) f32     conv taps
    # x_ref : VMEM (1, C, HW)   one batch, fully resident
    # o_ref : VMEM (1, C, HW)
    x = x_ref[...]
    mean = jnp.sum(x.astype(jnp.float32), axis=-1) * inv_hw          # (1, C)

    pad = (k - 1) // 2
    c_idx = jax.lax.broadcasted_iota(jnp.int32, (1, c), 1)
    conv = jnp.zeros((1, c), jnp.float32)
    for j in range(k):  # k shifted multiply-adds (XLU roll + VPU FMA), no band matrix
        off = j - pad
        shifted = mean if off == 0 else pltpu.roll(mean, (-off) % c, 1)
        valid = (c_idx + off >= 0) & (c_idx + off < c)
        conv = conv + w_ref[j] * jnp.where(valid, shifted, 0.0)

    att = jax.nn.sigmoid(conv).astype(x.dtype)                       # (1, C)
    o_ref[...] = x * att[:, :, None]


# ---------------------------------------------------------------------------
# TWO-PHASE fallback kernels
# ---------------------------------------------------------------------------
def _tile_sum_kernel(x_ref, ps_ref, *, hw, tile_hw):
    # x_ref : VMEM (1, C, T) ; ps_ref : VMEM (1, 1, 1, C) per-(batch, tile) sums
    x = x_ref[...].astype(jnp.float32)
    if hw % tile_hw:  # ragged last tile: zero the lanes past the end of H*W
        lane = jax.lax.broadcasted_iota(jnp.int32, x.shape, 2)
        x = jnp.where(pl.program_id(1) * tile_hw + lane < hw, x, 0.0)
    ps_ref[...] = jnp.sum(x, axis=-1)[:, None, None, :]


def _scale_kernel(att_ref, x_ref, o_ref):
    # att_ref : VMEM (1, C, 1) f32 ; x_ref / o_ref : VMEM (1, C, T)
    o_ref[...] = x_ref[...] * att_ref[...].astype(x_ref.dtype)


# ---------------------------------------------------------------------------
# wrapper
# ---------------------------------------------------------------------------
def eca_forward(x_nchw, weight, *, target_block_bytes=None, force_two_phase=False):
    """x_nchw: (B, C, H, W); weight: (k,) Conv1d taps. Returns (B, C, H, W)."""
    B, C, H, W = x_nchw.shape
    HW = H * W
    dtype = x_nchw.dtype
    itemsize = jnp.dtype(dtype).itemsize
    x_flat = x_nchw.reshape(B, C, HW)
    weight = weight.astype(jnp.float32)
    k = int(weight.shape[0])

    cap = _vmem_capacity_bytes()
    if target_block_bytes is None:
        # bigger streaming blocks on v7x (3.2 TB/s HBM), ~4 MiB elsewhere
        target_block_bytes = 6 * _MIB if cap <= 64 * _MIB else 4 * _MIB

    slab_bytes = C * HW * itemsize
    fused_budget = min(cap // 2, 48 * _MIB)
    # in + out double buffers (~4x slab) + f32 upcast headroom
    use_fused = (not force_two_phase) and (5 * slab_bytes + (256 << 10)) <= fused_budget

    if use_fused:
        fused_cost = pl.CostEstimate(
            flops=2 * B * C * HW + 2 * k * B * C,
            transcendentals=B * C,
            bytes_accessed=2 * B * C * HW * itemsize + k * 4,
        )
        out = pl.pallas_call(
            partial(_eca_fused_kernel, k=k, c=C, inv_hw=1.0 / float(HW)),
            out_shape=jax.ShapeDtypeStruct((B, C, HW), dtype),
            grid_spec=pltpu.PrefetchScalarGridSpec(
                num_scalar_prefetch=0,
                grid=(B,),
                in_specs=[
                    pl.BlockSpec(memory_space=pltpu.MemorySpace.SMEM),  # conv taps
                    pl.BlockSpec((1, C, HW), lambda b: (b, 0, 0)),      # x slab
                ],
                out_specs=pl.BlockSpec((1, C, HW), lambda b: (b, 0, 0)),
            ),
            compiler_params=pltpu.CompilerParams(
                dimension_semantics=("parallel",),
                vmem_limit_bytes=fused_budget,
            ),
            cost_estimate=fused_cost,
        )(weight, x_flat)
        return out.reshape(B, C, H, W)

    # ---- two-phase fallback: slab too large for VMEM residency ----
    tile_hw = _pick_hw_tile(HW, C, itemsize, target_block_bytes)
    n_hw = pl.cdiv(HW, tile_hw)
    vmem_limit = min((cap * 3) // 4, 64 * _MIB)

    # Phase 1: per-(batch, tile) partial channel sums; both grid axes parallel.
    ps = pl.pallas_call(
        partial(_tile_sum_kernel, hw=HW, tile_hw=tile_hw),
        out_shape=jax.ShapeDtypeStruct((B, n_hw, 1, C), jnp.float32),
        grid_spec=pltpu.PrefetchScalarGridSpec(
            num_scalar_prefetch=0,
            grid=(B, n_hw),
            in_specs=[pl.BlockSpec((1, C, tile_hw), lambda b, t: (b, 0, t))],
            out_specs=pl.BlockSpec((1, 1, 1, C), lambda b, t: (b, t, 0, 0)),
        ),
        compiler_params=pltpu.CompilerParams(
            dimension_semantics=("parallel", "parallel"),
            vmem_limit_bytes=vmem_limit,
        ),
        cost_estimate=pl.CostEstimate(
            flops=B * C * HW,
            transcendentals=0,
            bytes_accessed=B * C * HW * itemsize + B * n_hw * C * 4,
        ),
    )(x_flat)

    # Tiny finishers in plain JAX: reduce partial sums, conv taps, sigmoid.
    pooled = jnp.sum(ps[:, :, 0, :], axis=1) * (1.0 / float(HW))     # (B, C)
    att = _conv1d_sigmoid(pooled, weight).reshape(B, C, 1)           # (B, C, 1) f32

    # Phase 2: streamed broadcast multiply (the HBM-heavy part), fully parallel.
    out = pl.pallas_call(
        _scale_kernel,
        out_shape=jax.ShapeDtypeStruct((B, C, HW), dtype),
        grid_spec=pltpu.PrefetchScalarGridSpec(
            num_scalar_prefetch=0,
            grid=(B, n_hw),
            in_specs=[
                pl.BlockSpec((1, C, 1), lambda b, t: (b, 0, 0)),        # gate
                pl.BlockSpec((1, C, tile_hw), lambda b, t: (b, 0, t)),  # x tile
            ],
            out_specs=pl.BlockSpec((1, C, tile_hw), lambda b, t: (b, 0, t)),
        ),
        compiler_params=pltpu.CompilerParams(
            dimension_semantics=("parallel", "parallel"),
            vmem_limit_bytes=vmem_limit,
        ),
        cost_estimate=pl.CostEstimate(
            flops=B * C * HW,
            transcendentals=0,
            bytes_accessed=2 * B * C * HW * itemsize + B * C * 4,
        ),
    )(att, x_flat)
    return out.reshape(B, C, H, W)


# ---------------------------------------------------------------------------
# pure-JAX reference (matches the PyTorch forward)
# ---------------------------------------------------------------------------
def eca_reference(x, weight):
    B, C, H, W = x.shape
    k = weight.shape[0]
    pad = (k - 1) // 2
    y = jnp.mean(x.astype(jnp.float32), axis=(2, 3))        # (B, C)
    yp = jnp.pad(y, ((0, 0), (pad, pad)))
    conv = jnp.zeros((B, C), jnp.float32)
    for j in range(k):
        conv = conv + weight[j] * yp[:, j:j + C]
    att = jax.nn.sigmoid(conv)
    return x * att[:, :, None, None].astype(x.dtype)


if __name__ == "__main__":
    # Module hyperparameters: channel=16 -> t = int(abs(log2(16)+1)/2) = 2 -> k_size = 3
    channel = 16
    t = int(abs(math.log(channel, 2) + 1) / 2)
    k_size = t if t % 2 else t + 1

    key = jax.random.PRNGKey(0)
    k_w, k_x1, k_x2, k_x3 = jax.random.split(key, 4)

    # PyTorch Conv1d default init: U(-1/sqrt(fan_in), 1/sqrt(fan_in)), fan_in = k.
    bound = 1.0 / math.sqrt(k_size)
    weight = jax.random.uniform(k_w, (k_size,), jnp.float32, minval=-bound, maxval=bound)

    # 1) Fused single-pass path, lane-aligned HW (16*16 = 256).
    x1 = jax.random.normal(k_x1, (2, channel, 16, 16), jnp.float32)
    out1 = jax.block_until_ready(eca_forward(x1, weight))
    ref1 = eca_reference(x1, weight)
    assert out1.shape == x1.shape
    assert jnp.allclose(out1, ref1, atol=1e-5, rtol=1e-5), "mismatch (fused, aligned)"

    # 2) Fused path with a ResNet-style small spatial size (HW = 49, not /128).
    x2 = jax.random.normal(k_x2, (2, channel, 7, 7), jnp.float32)
    out2 = jax.block_until_ready(eca_forward(x2, weight))
    ref2 = eca_reference(x2, weight)
    assert jnp.allclose(out2, ref2, atol=1e-5, rtol=1e-5), "mismatch (fused, 7x7)"

    # 3) Forced two-phase fallback with tiny tiles: exercises the fully parallel
    #    partial-sum grid, the ragged (masked) last HW tile, and the partial
    #    write-back of the final multiply tile.
    x3 = jax.random.normal(k_x3, (2, channel, 20, 20), jnp.float32)   # HW = 400
    out3 = jax.block_until_ready(
        eca_forward(x3, weight, force_two_phase=True, target_block_bytes=8 * 1024))
    ref3 = eca_reference(x3, weight)
    assert jnp.allclose(out3, ref3, atol=1e-5, rtol=1e-5), "mismatch (two-phase, ragged)"

    print("KERNEL_OK")
</pallas_src>

<mosaic_0001>
module attributes {stable_mosaic.version = 11 : i64} {
  func.func @_eca_fused_kernel(%arg0: i32, %arg1: memref<3xf32, #tpu.memory_space<smem>>, %arg2: memref<1x16x256xf32, #tpu.memory_space<vmem>>, %arg3: memref<1x16x256xf32, #tpu.memory_space<vmem>>) attributes {dimension_semantics = [#tpu.dimension_semantics<parallel>], iteration_bounds = array<i64: 2>, scalar_prefetch = 0 : i64, scratch_operands = 0 : i64, tpu.core_type = #tpu.core_type<tc>, window_params = [{transform_indices = @transform_0, window_bounds = array<i64: 3>}, {transform_indices = @transform_1, window_bounds = array<i64: 1, 16, 256>}, {transform_indices = @transform_2, window_bounds = array<i64: 1, 16, 256>}]} {
    %c0 = arith.constant 0 : index
    %c0_0 = arith.constant 0 : index
    %c0_1 = arith.constant 0 : index
    %0 = vector.load %arg2[%c0, %c0_0, %c0_1] : memref<1x16x256xf32, #tpu.memory_space<vmem>>, vector<1x16x256xf32>
    %cst = arith.constant dense<0.000000e+00> : vector<1x16xf32>
    %1 = vector.multi_reduction <add>, %0, %cst [2] : vector<1x16x256xf32> to vector<1x16xf32>
    %cst_2 = arith.constant 3.906250e-03 : f32
    %2 = vector.broadcast %cst_2 : f32 to vector<1x16xf32>
    %3 = arith.mulf %1, %2 : vector<1x16xf32>
    %4 = tpu.iota {dimensions = array<i32: 1>} : vector<1x16xi32>
    %cst_3 = arith.constant 0.000000e+00 : f32
    %5 = vector.broadcast %cst_3 : f32 to vector<1x16xf32>
    %c1_i32 = arith.constant 1 : i32
    %6 = tpu.dynamic_rotate %3 by %c1_i32 dim 1 : vector<1x16xf32>, i32 -> vector<1x16xf32>
    %c-1_i32 = arith.constant -1 : i32
    %7 = vector.broadcast %c-1_i32 : i32 to vector<1x16xi32>
    %8 = arith.addi %4, %7 : vector<1x16xi32>
    %c0_i32 = arith.constant 0 : i32
    %9 = vector.broadcast %c0_i32 : i32 to vector<1x16xi32>
    %10 = arith.cmpi sge, %8, %9 : vector<1x16xi32>
    %c-1_i32_4 = arith.constant -1 : i32
    %11 = vector.broadcast %c-1_i32_4 : i32 to vector<1x16xi32>
    %12 = arith.addi %4, %11 : vector<1x16xi32>
    %c16_i32 = arith.constant 16 : i32
    %13 = vector.broadcast %c16_i32 : i32 to vector<1x16xi32>
    %14 = arith.cmpi slt, %12, %13 : vector<1x16xi32>
    %15 = arith.andi %10, %14 : vector<1x16xi1>
    %c0_5 = arith.constant 0 : index
    %16 = memref.load %arg1[%c0_5] : memref<3xf32, #tpu.memory_space<smem>>
    %cst_6 = arith.constant 0.000000e+00 : f32
    %17 = vector.broadcast %cst_6 : f32 to vector<1x16xf32>
    %18 = arith.select %15, %6, %17 : vector<1x16xi1>, vector<1x16xf32>
    %19 = vector.broadcast %16 : f32 to vector<1x16xf32>
    %20 = arith.mulf %19, %18 : vector<1x16xf32>
    %21 = arith.addf %5, %20 : vector<1x16xf32>
    %c0_i32_7 = arith.constant 0 : i32
    %22 = vector.broadcast %c0_i32_7 : i32 to vector<1x16xi32>
    %23 = arith.addi %4, %22 : vector<1x16xi32>
    %c0_i32_8 = arith.constant 0 : i32
    %24 = vector.broadcast %c0_i32_8 : i32 to vector<1x16xi32>
    %25 = arith.cmpi sge, %23, %24 : vector<1x16xi32>
    %c0_i32_9 = arith.constant 0 : i32
    %26 = vector.broadcast %c0_i32_9 : i32 to vector<1x16xi32>
    %27 = arith.addi %4, %26 : vector<1x16xi32>
    %c16_i32_10 = arith.constant 16 : i32
    %28 = vector.broadcast %c16_i32_10 : i32 to vector<1x16xi32>
    %29 = arith.cmpi slt, %27, %28 : vector<1x16xi32>
    %30 = arith.andi %25, %29 : vector<1x16xi1>
    %c1 = arith.constant 1 : index
    %31 = memref.load %arg1[%c1] : memref<3xf32, #tpu.memory_space<smem>>
    %cst_11 = arith.constant 0.000000e+00 : f32
    %32 = vector.broadcast %cst_11 : f32 to vector<1x16xf32>
    %33 = arith.select %30, %3, %32 : vector<1x16xi1>, vector<1x16xf32>
    %34 = vector.broadcast %31 : f32 to vector<1x16xf32>
    %35 = arith.mulf %34, %33 : vector<1x16xf32>
    %36 = arith.addf %21, %35 : vector<1x16xf32>
    %c15_i32 = arith.constant 15 : i32
    %37 = tpu.dynamic_rotate %3 by %c15_i32 dim 1 : vector<1x16xf32>, i32 -> vector<1x16xf32>
    %c1_i32_12 = arith.constant 1 : i32
    %38 = vector.broadcast %c1_i32_12 : i32 to vector<1x16xi32>
    %39 = arith.addi %4, %38 : vector<1x16xi32>
    %c0_i32_13 = arith.constant 0 : i32
    %40 = vector.broadcast %c0_i32_13 : i32 to vector<1x16xi32>
    %41 = arith.cmpi sge, %39, %40 : vector<1x16xi32>
    %c1_i32_14 = arith.constant 1 : i32
    %42 = vector.broadcast %c1_i32_14 : i32 to vector<1x16xi32>
    %43 = arith.addi %4, %42 : vector<1x16xi32>
    %c16_i32_15 = arith.constant 16 : i32
    %44 = vector.broadcast %c16_i32_15 : i32 to vector<1x16xi32>
    %45 = arith.cmpi slt, %43, %44 : vector<1x16xi32>
    %46 = arith.andi %41, %45 : vector<1x16xi1>
    %c2 = arith.constant 2 : index
    %47 = memref.load %arg1[%c2] : memref<3xf32, #tpu.memory_space<smem>>
    %cst_16 = arith.constant 0.000000e+00 : f32
    %48 = vector.broadcast %cst_16 : f32 to vector<1x16xf32>
    %49 = arith.select %46, %37, %48 : vector<1x16xi1>, vector<1x16xf32>
    %50 = vector.broadcast %47 : f32 to vector<1x16xf32>
    %51 = arith.mulf %50, %49 : vector<1x16xf32>
    %52 = arith.addf %36, %51 : vector<1x16xf32>
    %53 = arith.negf %52 : vector<1x16xf32>
    %54 = math.exp %53 : vector<1x16xf32>
    %cst_17 = arith.constant 1.000000e+00 : f32
    %55 = vector.broadcast %cst_17 : f32 to vector<1x16xf32>
    %56 = arith.addf %55, %54 : vector<1x16xf32>
    %57 = arith.divf %55, %56 : vector<1x16xf32>
    %58 = vector.shape_cast %57 : vector<1x16xf32> to vector<1x16x1xf32>
    %59 = vector.broadcast %58 : vector<1x16x1xf32> to vector<1x16x256xf32>
    %60 = arith.mulf %0, %59 : vector<1x16x256xf32>
    %c0_18 = arith.constant 0 : index
    %c0_19 = arith.constant 0 : index
    %c0_20 = arith.constant 0 : index
    %61 = vector.load %arg3[%c0_18, %c0_19, %c0_20] : memref<1x16x256xf32, #tpu.memory_space<vmem>>, vector<1x16x256xf32>
    tpu.vector_store %arg3[%c0_18, %c0_19, %c0_20], %60 {strides = array<i32>} : memref<1x16x256xf32, #tpu.memory_space<vmem>>, vector<1x16x256xf32>,
    return
  }
  func.func @transform_0(%arg0: i32) -> i32 {
    %c0_i32 = arith.constant 0 : i32
    %c0_i32_0 = arith.constant 0 : i32
    return %c0_i32 : i32
  }
  func.func @transform_1(%arg0: i32) -> (i32, i32, i32) {
    %c0_i32 = arith.constant 0 : i32
    %c0_i32_0 = arith.constant 0 : i32
    %c0_i32_1 = arith.constant 0 : i32
    return %arg0, %c0_i32, %c0_i32_0 : i32, i32, i32
  }
  func.func @transform_2(%arg0: i32) -> (i32, i32, i32) {
    %c0_i32 = arith.constant 0 : i32
    %c0_i32_0 = arith.constant 0 : i32
    %c0_i32_1 = arith.constant 0 : i32
    return %arg0, %c0_i32, %c0_i32_0 : i32, i32, i32
  }
}

</mosaic_0001>

<bundles_post_ra>
// kernel: tpu_custom_call.1
= control target key start
LH: loop header
LB: loop body
LE: loop exit
PB: predicated region body
PF: predicated region fallthrough
CT: control target
= control target key end

     0   :  { %7 = vsyncpa [#allocation5], 0  ;;  %s776_s0 = inlined_call_operand.hbm [shape: f32[3], index: 0, kind: input, shape index: {}]   ;;  %s777_s1 = inlined_call_operand.hbm [shape: f32[2,16,256], index: 1, kind: input, shape index: {}]   ;;  %s778_s2 = inlined_call_operand.hbm [shape: f32[2,16,256], index: 2, kind: output, shape index: {}]  }
   0x1   :  { %8 = vsyncpa [#allocation3], 0 }
   0x2   :  { %10 = vsyncpa [#allocation3 + $0x1], 0 }
   0x3   :  { %11 = vsyncpa [#allocation4], 0 }
   0x4   :  { %13 = vsyncpa [#allocation4 + $0x1], 0  ;;  %s611_s9 = smov 0   ;;  %s613_s10 = smov 0  }
   0x5   :  { %s615_s11 = smov 0   ;;  %s617_s12 = smov 0  }
   0x6 LB: > { %s632_s13 = sadd.s32 4294967295, %s587_s12   ;;  %s381_s14 = sadd.s32 4294967294, %s587_s12   ;;  %s587_s12 = sphi %s617_s12, %s789_s12   ;;  %s583_s11 = sphi %s615_s11, %s788_s11   ;;  %s579_s10 = sphi %s613_s10, %s787_s10   ;;  %s575_s9 = sphi %s611_s9, %s786_s9  }
   0x7   : > { %s636_s15 = sadd.s32 1, %s587_s12   ;;  %s47_s16 = sadd.s32 1, %s583_s11 }
   0x8   : > { %s44_s17 = ssub.s32 %s587_s12, %s636_s15  ;;  %p54_p0 = scmp.ne.s32.totalorder %s583_s11, %s579_s10 }
   0x9   : > { %p45_p1 = scmp.eq.s32.totalorder %s44_s17, 0  ;;  %p55_p2 = scmp.eq.s32.totalorder %s587_s12, 0 }
   0xa   : > { %p60_p3 = scmp.ne.s32.totalorder %s579_s10, %s575_s9  ;;  %p61_p4 = scmp.eq.s32.totalorder %s632_s13, 0 }
   0xb   : > { %s648_s18 = scalar_select %p45_p1, %s583_s11, %s47_s16  }
   0xc   : > { %p650_p5 = por %p55_p2, %p54_p0  ;;  %p656_p6 = por %p61_p4, %p60_p3 }
   0xd   : > { %p84_p7 = scmp.eq.s32.totalorder %s632_s13, 1  ;;  %p90_p8 = scmp.eq.s32.totalorder %s381_s14, 1 }
   0xe   : > { %p382_p9 = scmp.ge.s32.totalorder %s587_s12, 1  ;;  %p97_p10 = scmp.lt.s32.totalorder %s587_s12, 3 }
   0xf   : > { %p663_p11 = por %p84_p7, %p54_p0  ;;  %p667_p12 = por %p90_p8, %p60_p3 }
  0x10   : > { %p671_p13 = pnand %p382_p9, %p97_p10  ;;  %s109_s26 = sshll.u32 %s776_s0, 4  ;;  %s110_s26 = int_to_ptr.hbm [resolvable:$true] %s109_s26 }
  0x11   : > { %p423_p2 = scmp.lt.s32.totalorder %s587_s12, 2  ;;  %s120_s27 = sand.u32 1, %s583_s11  }
  0x12   : > { %p410_p1 = pneg %p671_p13  ;;  %s385_s29 = sshll.u32 %s120_s27, 5 }
  0x13   : > { %p687_p3 = pnand %p423_p2, %p650_p5  ;;  %s589_s30 = smov [#allocation2]  }
  0x14   : > { %p411_p7 = pnand %p410_p1, %p61_p4  ;;  %s400_s3 = sshll.u32 %s587_s12, 5 }
  0x15   : > { %s124_s4 = scalar_lea.vmem [#allocation6], %s385_s29  ;;  %s129_s8 = scalar_lea.hbm %s777_s1, %s400_s3 }
  0x16   : > { %413 = dma.hbm_to_smem (!%p411_p7), %s110_s26, 16, %s589_s30, [#allocation5]  }
  0x17   : > { %s132_s5 = sshll.u32 %s124_s4, 4  ;;  %s130_s14 = sshll.u32 %s129_s8, 4  ;;  %s133_s5 = int_to_ptr.vmem [resolvable:$true] %s132_s5  ;;  %s131_s14 = int_to_ptr.hbm [resolvable:$true] %s130_s14 }
  0x18   : > { %s121_s16 = scalar_lea.sflag [#allocation3], %s120_s27  ;;  %s487_s17 = sshra.s32 %s131_s14, 4  ;;  %s488_s17 = int_to_ptr.hbm [resolvable:$true] %s487_s17 }
  0x19   : > { %s489_s19 = scalar_lea.hbm %s488_s17, 32  ;;  %p491_p8 = pneg %p687_p3 }
  0x1a   : > { %p490_p5 = scmp.ne.s32.totalorder %s488_s17, %s489_s19  ;;  %s494_s26 = scalar_lea.hbm %s777_s1, 64 }
  0x1b   : > { %p495_p1 = scmp.lt.s32.totalorder %s488_s17, %s777_s1  ;;  %p496_p2 = scmp.lt.s32.totalorder %s494_s26, %s489_s19 }
  0x1c   : > { %p492_p9 = pnand %p491_p8, %p490_p5 }
  0x1d   : > { %p497_p7 = por %p496_p2, %p495_p1 }
  0x1e   : > { %p493_p10 = pneg %p492_p9 }
  0x20   : > { %p498_p0 = pnand %p497_p7, %p493_p10 }
  0x22   : > { %501 = shalt.err (!%p498_p0)
}
  0x23   : > { %s590_s27 = smov 256   ;;  %s591_s3 = smov 16  }
  0x24   : > { %417 = dma.hbm_to_vmem [thread:$0]  (!%p687_p3), %s131_s14, 512, %s133_s5, %s121_s16, %s590_s27, %s590_s27, %s591_s3  }
  0x25   : > { %144 = sbr.rel (%p671_p13) target bundleno = 671 (0x29f), region = 28 }
  0x2a   : > { %562 = dma.done.wait (%p61_p4), [#allocation5], 16  }
  0x2b   : > { %564 = vsyncadd (%p61_p4), [#allocation5], 4294967280  ;;  %s712_s4 = sand.u32 1, %s579_s10  }
  0x2c   : > { %s390_s6 = sshll.u32 %s712_s4, 5  ;;  %s152_s7 = scalar_lea.sflag [#allocation3], %s712_s4 }
  0x2d   : > { %s155_s28 = scalar_lea.vmem [#allocation6], %s390_s6 }
  0x2e   : > { %566 = dma.done.wait (%p656_p6), %s152_s7, 512  }
  0x2f   : > { %568 = vsyncadd (%p656_p6), %s152_s7, 4294966784 }
  0x30   : > { %161 = sfence }
  0x31   : > { %v722_v0 = vld [vmem:[%s155_s28] sm:$0xff]  ;;  %v724_v1 = vld [vmem:[%s155_s28 + $0x8] sm:$0xff]  ;;  %v728_v3 = vld [vmem:[%s155_s28 + $0x10] sm:$0xff]  ;;  %v190_v7 = vlaneseq  ;;  %vm197_vm0 = vcmask 130112   ;;  %s592_s20 = smov 16   ;;  %vm200_vm1 = vcmask 1047680  }
  0x32   : > { %v182_v2 = vadd.f32 %v724_v1, %v722_v0  ;;  %v730_v4 = vld [vmem:[%s155_s28 + $0x18] sm:$0xff]  ;;  %s593_s23 = smov 113   ;;  %s594_s5 = smov 127  }
  0x33   : > { %v185_v5 = vadd.f32 %v730_v4, %v728_v3  ;;  %v191_v8 = vand.u32 127, %v190_v7  ;;  %v261_v21 = vshrl.u32 %v190_v7, 7  ;;  %s211_s8 = sld [smem:[#allocation2]]  ;;  %s401_s17 = sshll.u32 %s632_s13, 5 }
  0x34   : > { %183 = vadd.xlane.f32.xlu0 %v182_v2  ;;  %s392_s14 = sld [smem:[#allocation2 + $0x1]]  ;;  %s292_s25 = scalar_lea.hbm %s778_s2, %s401_s17 }
  0x35   : > { %v195_v10 = vadd.s32 4294967288, %v191_v8  ;;  %v207_v20 = vadd.s32 4294967295, %v191_v8  ;;  %465 = vset.pattern.permute.xlu0 %v261_v21  ;;  %v268_v22 = vadd.s32 8, %v261_v21  ;;  %s393_s16 = sld [smem:[#allocation2 + $0x2]]  ;;  %vm221_vm5 = vcmp.lt.s32.totalorder %v191_v8, 16  ;;  %s177_s26 = scalar_lea.vmem [#allocation7], %s390_s6 }
  0x36   : > { %v228_v24 = vadd.s32 1, %v191_v8  ;;  %s293_s29 = sshll.u32 %s177_s26, 4  ;;  %s295_s30 = sshll.u32 %s292_s25, 4  ;;  %s294_s29 = int_to_ptr.vmem [resolvable:$true] %s293_s29  ;;  %s296_s30 = int_to_ptr.hbm [resolvable:$true] %s295_s30 }
  0x37   : > { %vm208_vm2 = vcmp.ge.s32.totalorder %v207_v20, 0  ;;  %vm209_vm3 = vcmp.lt.s32.totalorder %v207_v20, 16  ;;  %466 = vset.pattern.permute.xlu1 %v268_v22  ;;  %s281_s13 = scalar_lea.sflag [#allocation4], %s712_s4  ;;  %s531_s27 = sshra.s32 %s296_s30, 4  ;;  %s532_s27 = int_to_ptr.hbm [resolvable:$true] %s531_s27 }
  0x38   : > { %vm210_vm4 = vmand %vm208_vm2, %vm209_vm3  ;;  %vm230_vm6 = vcmp.lt.s32.totalorder %v228_v24, 16  ;;  %s533_s3 = scalar_lea.hbm %s532_s27, 32  ;;  %s537_s28 = scalar_lea.hbm %s778_s2, 64 }
  0x39   : > { %v217_v25 = vstv %s211_s8  ;;  %p534_p4 = scmp.ne.s32.totalorder %s532_s27, %s533_s3  ;;  %p538_p0 = scmp.lt.s32.totalorder %s532_s27, %s778_s2 }
  0x3a   : > { %v225_v27 = vstv %s392_s14  ;;  %p539_p3 = scmp.lt.s32.totalorder %s537_s28, %s533_s3 }
  0x3b   : > { %v237_v30 = vstv %s393_s16  ;;  %p535_p6 = pnand %p534_p4, %p663_p11 }
  0x3c   : > { %186 = vadd.xlane.f32.xlu0 %v185_v5  ;;  %p540_p5 = por %p539_p3, %p538_p0 }
  0x3d   : > { %p536_p13 = pneg %p535_p6 }
  0x3f   : > { %p541_p8 = pnand %p540_p5, %p536_p13 }
  0xa7   : > { %v184_v6 = vpop.xlane.xlu0 %183 }
  0xa8   : > { %v188_v9 = vmul.f32 0.00390625, %v184_v6 }
  0xaa   : > { %v194_v13 = vperm.slane %v188_v9, %v191_v8 }
  0xaf   : > { %v187_v11 = vpop.xlane.xlu0 %186 }
  0xb0   : > { %v189_v12 = vmul.f32 0.00390625, %v187_v11 }
  0xb2   : > { %v196_v14 = vperm.slane %v189_v12, %v195_v10 }
  0xb4   : > { %v198_v15 = vsel %vm197_vm0, %v196_v14, %v194_v13 }
  0xb5   : > { %201 = vrot.lane.b32.xlu1 %v198_v15, %s592_s20  ;;  %v224_v28 = vsel %vm221_vm5, %v198_v15, 0.0 }
  0xb6   : > { %v226_v31 = vmul.f32 %v225_v27, %v224_v28 }
 0x127   : > { %v202_v16 = vpop.permute.xlu1 %201 }
 0x128   : > { %v203_v17 = vsel %vm200_vm1, %v202_v16, %v198_v15 }
 0x129   : > { %204 = vrot.lane.b32.xlu1 %v203_v17, %s592_s20 }
 0x19b   : > { %v205_v18 = vpop.permute.xlu1 %204 }
 0x19c   : > { %v206_v19 = vsel %vm200_vm1, %v205_v18, %v198_v15 }
 0x19d   : > { %213 = vrot.lane.b32.xlu2 %v206_v19, %s593_s23 }
 0x1a5   : > { %233 = vrot.lane.b32.xlu2 %v206_v19, %s594_s5 }
 0x1f7   : > { %v214_v23 = vpop.permute.xlu2 %213 }
 0x1f8   : > { %v216_v26 = vsel %vm210_vm4, %v214_v23, 0.0 }
 0x1f9   : > { %v218_v29 = vmul.f32 %v217_v25, %v216_v26 }
 0x1fb   : > { %v227_v34 = vadd.f32 %v226_v31, %v218_v29 }
 0x1ff   : > { %v234_v32 = vpop.permute.xlu2 %233 }
 0x200   : > { %v236_v33 = vsel %vm230_vm6, %v234_v32, 0.0 }
 0x201   : > { %v238_v35 = vmul.f32 %v237_v30, %v236_v33 }
 0x203   : > { %v239_v36 = vadd.f32 %v238_v35, %v227_v34 }
 0x205   : > { %v394_v37 = vmul.f32 -1.442695, %v239_v36 }
 0x207   : > { %468 = vpow2.f32 %v394_v37 }
 0x20d   : > { %v469_v38 = vpop.eup %468 }
 0x20e   : > { %v243_v39 = vadd.f32 1.0, %v469_v38 }
 0x210   : > { %470 = vrcp.f32 %v243_v39  ;;  %v255_v43 = vand.u32 2147483648, %v243_v39  ;;  %v253_v45 = vand.u32 2147483647, %v243_v39  ;;  %vm249_vm8 = vweird.f32 %v243_v39 }
 0x212   : > { %v256_v47 = vor.u32 1.1754944e-38, %v255_v43  ;;  %vm254_vm10 = vcmp.eq.f32.partialorder %v253_v45, 8.507059e+37 }
 0x216   : > { %v471_v40 = vpop.eup %470 }
 0x217   : > { %v245_v41 = vmul.f32 %v471_v40, %v243_v39  ;;  %vm250_vm7 = vweird.f32 %v471_v40 }
 0x218   : > { %vm251_vm9 = vmor %vm249_vm8, %vm250_vm7 }
 0x219   : > { %v246_v42 = vsub.f32 1.0, %v245_v41 }
 0x21b   : > { %v247_v44 = vmul.f32 %v471_v40, %v246_v42 }
 0x21d   : > { %v248_v46 = vadd.f32 %v471_v40, %v247_v44 }
 0x21f   : > { %v252_v48 = vsel %vm251_vm9, %v471_v40, %v248_v46 }
 0x220   : > { %v257_v49 = vsel %vm254_vm10, %v256_v47, %v252_v48 }
 0x221   : > { %v259_v50 = vperm.slane %v257_v49, 0 }
 0x223   : > { %270 = vperm.xlu1 %466, %v259_v50   ;;  %264 = vperm.xlu0 %465, %v259_v50  }
 0x22b   : > { %467 = vset.pattern.permute.xlu0 %v268_v22 }
 0x295   : > { %v271_v51 = vpop.permute.xlu1 %270  ;;  %v265_v52 = vpop.permute.xlu0 %264 }
 0x296   : > { %v274_v53 = vmul.f32 %v271_v51, %v728_v3  ;;  %v275_v54 = vmul.f32 %v271_v51, %v730_v4  ;;  %v272_v55 = vmul.f32 %v265_v52, %v722_v0  ;;  %v273_v56 = vmul.f32 %v265_v52, %v724_v1 }
 0x298   : > { %278 = vst [vmem:[%s177_s26 + $0x10] sm:$0xff] %v274_v53 }
 0x299   : > { %279 = vst [vmem:[%s177_s26 + $0x18] sm:$0xff] %v275_v54 }
 0x29a   : > { %276 = vst [vmem:[%s177_s26] sm:$0xff] %v272_v55 }
 0x29b   : > { %277 = vst [vmem:[%s177_s26 + $0x8] sm:$0xff] %v273_v56 }
 0x29c   : > { %544 = shalt.err (!%p541_p8)
}
 0x29d   : > { %s595_s4 = smov 256  }
 0x29e   : > { %408 = dma.vmem_to_hbm [thread:$0]  (%p663_p11), %s294_s29, 512, %s296_s30, %s281_s13, %s595_s4, %s595_s4, %s592_s20  }
 0x29f PF: > { %s310_s8 = sand.u32 1, %s575_s9   ;;  %p785_p9 = scmp.ge.s32.totalorder %s587_s12, 2 }
 0x2a0   : > { %s311_s14 = scalar_lea.sflag [#allocation4], %s310_s8 }
 0x2a1   : > { %p419_p10 = pnand %p785_p9, %p667_p12 }
 0x2a3   : > { %p420_p1 = pneg %p419_p10 }
 0x2a5   : > { %570 = dma.done.wait (%p420_p1), %s311_s14, 512  }
 0x2a6   : > { %572 = vsyncadd (%p420_p1), %s311_s14, 4294966784  ;;  %p16_p2 = scmp.ge.s32.totalorder %s636_s15, 4   ;;  %s786_s9 = smov %s579_s10 }
 0x2a7   : > { %s787_s10 = smov %s583_s11  ;;  %s788_s11 = smov %s648_s18 }
 0x2a8   : > { %s789_s12 = smov %s636_s15  ;;  %18 = sbr.rel (!%p16_p2) target bundleno = 6 (0x6), region = 78 }
 0x2ad   :  { %317 = vsyncpa [#allocation3], 1 }
 0x2ae   :  { %319 = vsyncpa [#allocation3 + $0x1], 1 }
 0x2af   :  { %320 = vsyncpa [#allocation4], 1 }
 0x2b0   :  { %322 = vsyncpa [#allocation4 + $0x1], 1 }
 0x2b1   :  { %323 = vsyncpa [#allocation5], 1 }
 0x2b2   :  { %325 = vsyncpa [#allocation5 + $0x1], 1 }

</bundles_post_ra>
